<compile_context>
chip_gen: v7x
topology: tpu7x:2x2x1
jax: 0.10.0
libtpu: 0.0.40
codegen_flags: <defaults>
</compile_context>

<pallas_src>
import jax
import jax.numpy as jnp
from jax.experimental import pallas as pl
from jax.experimental.pallas import tpu as pltpu

IN_FEATURES = 11   # fc1 input features
IN_PAD = 16        # contraction padded to a sublane multiple (col 11 holds the "1" for the b1 fold)
HIDDEN = 64        # fc1 / fc2 width
HEAD = 2           # output1 / output2 width
OUT_W = 8          # lane-padded fused-head output width (cols 0:2 head1, 2:4 head2)


def _round_up(n, m):
    return ((n + m - 1) // m) * m


def mlp_two_head_kernel(x_ref, w1_ref, w2_ref, b2_ref, wd_ref, bd_ref, o_ref):
    """One batch tile of the fused MLP + two exact 2-class softmax heads.

    VMEM views per grid step:
      x:  (TB, 16)  (col 11 == 1.0 -> fc1 bias folded into w1 row 11)
      w1: (16, 64)
      w2: (64, 64)   b2: (1, 64)
      wd: (64, 8)    bd: (1, 8)    # per-head logit differences (+/-)
      o:  (TB, 8)    cols 0:2 = softmax(head1), cols 2:4 = softmax(head2)
    """
    x = x_ref[...]

    # fc1 + ReLU (bias folded into the matmul; zero pad rows keep it exact).
    h1 = jnp.dot(x, w1_ref[...], preferred_element_type=jnp.float32)
    h1 = jnp.maximum(h1, 0.0)

    # fc2 + ReLU.
    h2 = jnp.dot(h1, w2_ref[...], preferred_element_type=jnp.float32)
    h2 = jnp.maximum(h2 + b2_ref[...], 0.0)

    # Fused heads: d[:,0] = l1_0 - l1_1, d[:,1] = -(d[:,0]),
    #              d[:,2] = l2_0 - l2_1, d[:,3] = -(d[:,2]), rest 0.
    d = jnp.dot(h2, wd_ref[...], preferred_element_type=jnp.float32) + bd_ref[...]

    # Exact 2-class softmax: softmax([a, b])[0] = sigmoid(a - b).
    # Numerically-stable sigmoid over just 8 lanes.
    neg = d < 0.0
    z = jnp.exp(jnp.where(neg, d, -d))          # exp of a non-positive value
    o_ref[...] = jnp.where(neg, z, 1.0) / (1.0 + z)


def _prepare_params(params):
    """Pad / fuse raw (in, out)-layout params into the kernel-ready layout."""
    w1, b1, w2, b2, w3a, b3a, w3b, b3b = params

    # fc1: pad K 11 -> 16, fold b1 into row 11 (x column 11 is all ones).
    w1p = (jnp.zeros((IN_PAD, HIDDEN), jnp.float32)
           .at[:IN_FEATURES, :].set(w1.astype(jnp.float32))
           .at[IN_FEATURES, :].set(b1.astype(jnp.float32)))

    w2p = w2.astype(jnp.float32)
    b2p = b2.reshape(1, HIDDEN).astype(jnp.float32)

    # Fused 2-class heads: only the logit differences matter.
    d1w = (w3a[:, 0] - w3a[:, 1]).astype(jnp.float32)   # (64,)
    d2w = (w3b[:, 0] - w3b[:, 1]).astype(jnp.float32)   # (64,)
    d1b = (b3a[0] - b3a[1]).astype(jnp.float32)
    d2b = (b3b[0] - b3b[1]).astype(jnp.float32)

    wdp = (jnp.zeros((HIDDEN, OUT_W), jnp.float32)
           .at[:, 0].set(d1w).at[:, 1].set(-d1w)
           .at[:, 2].set(d2w).at[:, 3].set(-d2w))
    bdp = (jnp.zeros((1, OUT_W), jnp.float32)
           .at[0, 0].set(d1b).at[0, 1].set(-d1b)
           .at[0, 2].set(d2b).at[0, 3].set(-d2b))

    return w1p, w2p, b2p, wdp, bdp


def test1_forward(x, params, *, tile_rows=2048):
    """Returns (softmax(output1), softmax(output2)), each (B, 2)."""
    w1p, w2p, b2p, wdp, bdp = _prepare_params(params)

    B = x.shape[0]
    # Cap the tile so moderate batches give >= 2 grid steps (v7x: 2 TCs),
    # but never below 8 rows (sublane multiple).
    half = _round_up(max((B + 1) // 2, 1), 8)
    tb = max(8, min(tile_rows, half))
    b_pad = _round_up(B, tb)
    grid = (b_pad // tb,)

    # Pad batch rows (zeros), pad features 11 -> 16, and set the bias column.
    x_p = (jnp.zeros((b_pad, IN_PAD), jnp.float32)
           .at[:B, :IN_FEATURES].set(x.astype(jnp.float32))
           .at[:, IN_FEATURES].set(1.0))

    resident = lambda shape: pl.BlockSpec(shape, lambda i: (0, 0))

    cost = pl.CostEstimate(
        flops=2 * b_pad * (IN_PAD * HIDDEN + HIDDEN * HIDDEN + HIDDEN * OUT_W),
        transcendentals=b_pad * OUT_W,
        bytes_accessed=4 * (b_pad * IN_PAD + b_pad * OUT_W
                            + IN_PAD * HIDDEN
                            + HIDDEN * HIDDEN + HIDDEN
                            + HIDDEN * OUT_W + OUT_W),
    )

    out = pl.pallas_call(
        mlp_two_head_kernel,
        out_shape=jax.ShapeDtypeStruct((b_pad, OUT_W), jnp.float32),
        grid=grid,
        in_specs=[
            pl.BlockSpec((tb, IN_PAD), lambda i: (i, 0)),   # x: tiled over batch
            resident((IN_PAD, HIDDEN)),                     # w1 (b1 folded in)
            resident((HIDDEN, HIDDEN)),                     # w2
            resident((1, HIDDEN)),                          # b2
            resident((HIDDEN, OUT_W)),                      # fused head diffs
            resident((1, OUT_W)),                           # fused head bias diffs
        ],
        out_specs=pl.BlockSpec((tb, OUT_W), lambda i: (i, 0)),
        compiler_params=pltpu.CompilerParams(
            dimension_semantics=("parallel",)),
        cost_estimate=cost,
    )(x_p, w1p, w2p, b2p, wdp, bdp)

    return out[:B, 0:HEAD], out[:B, HEAD:2 * HEAD]


def init_params(key):
    """PyTorch nn.Linear-style init; weights stored as (in, out) == W_pt.T."""
    def linear(k, fan_in, fan_out):
        kw, kb = jax.random.split(k)
        bound = 1.0 / jnp.sqrt(float(fan_in))
        w = jax.random.uniform(kw, (fan_in, fan_out), jnp.float32, -bound, bound)
        b = jax.random.uniform(kb, (fan_out,), jnp.float32, -bound, bound)
        return w, b

    k1, k2, k3, k4 = jax.random.split(key, 4)
    w1, b1 = linear(k1, IN_FEATURES, HIDDEN)
    w2, b2 = linear(k2, HIDDEN, HIDDEN)
    w3a, b3a = linear(k3, HIDDEN, HEAD)   # output1
    w3b, b3b = linear(k4, HIDDEN, HEAD)   # output2
    return (w1, b1, w2, b2, w3a, b3a, w3b, b3b)


if __name__ == "__main__":
    key = jax.random.PRNGKey(0)
    kx, kp = jax.random.split(key)

    B = 8  # small demo batch
    x = jax.random.normal(kx, (B, IN_FEATURES), dtype=jnp.float32)
    params = init_params(kp)

    out1, out2 = test1_forward(x, params)
    out1 = jax.block_until_ready(out1)
    out2 = jax.block_until_ready(out2)

    # Pure-JAX reference (same math path as the PyTorch module).
    w1, b1, w2, b2, w3a, b3a, w3b, b3b = params
    h1 = jnp.maximum(x @ w1 + b1, 0.0)
    h2 = jnp.maximum(h1 @ w2 + b2, 0.0)
    ref1 = jax.nn.softmax(h2 @ w3a + b3a, axis=-1)
    ref2 = jax.nn.softmax(h2 @ w3b + b3b, axis=-1)

    assert out1.shape == (B, HEAD) and out2.shape == (B, HEAD)
    assert jnp.allclose(out1, ref1, atol=1e-4, rtol=1e-4)
    assert jnp.allclose(out2, ref2, atol=1e-4, rtol=1e-4)
    assert jnp.allclose(jnp.sum(out1, axis=-1), 1.0, atol=1e-4)
    assert jnp.allclose(jnp.sum(out2, axis=-1), 1.0, atol=1e-4)

    print("KERNEL_OK")
</pallas_src>

<mosaic_0001>
module attributes {stable_mosaic.version = 11 : i64} {
  func.func @mlp_two_head_kernel(%arg0: i32, %arg1: memref<8x16xf32, #tpu.memory_space<vmem>>, %arg2: memref<16x64xf32, #tpu.memory_space<vmem>>, %arg3: memref<64x64xf32, #tpu.memory_space<vmem>>, %arg4: memref<1x64xf32, #tpu.memory_space<vmem>>, %arg5: memref<64x8xf32, #tpu.memory_space<vmem>>, %arg6: memref<1x8xf32, #tpu.memory_space<vmem>>, %arg7: memref<8x8xf32, #tpu.memory_space<vmem>>) attributes {dimension_semantics = [#tpu.dimension_semantics<parallel>], iteration_bounds = array<i64: 1>, scalar_prefetch = 0 : i64, scratch_operands = 0 : i64, tpu.core_type = #tpu.core_type<tc>, window_params = [{transform_indices = @transform_0, window_bounds = array<i64: 8, 16>}, {pipeline_mode = #tpu.pipeline_mode<synchronous>, transform_indices = @transform_1, window_bounds = array<i64: 16, 64>}, {pipeline_mode = #tpu.pipeline_mode<synchronous>, transform_indices = @transform_2, window_bounds = array<i64: 64, 64>}, {pipeline_mode = #tpu.pipeline_mode<synchronous>, transform_indices = @transform_3, window_bounds = array<i64: 1, 64>}, {pipeline_mode = #tpu.pipeline_mode<synchronous>, transform_indices = @transform_4, window_bounds = array<i64: 64, 8>}, {pipeline_mode = #tpu.pipeline_mode<synchronous>, transform_indices = @transform_5, window_bounds = array<i64: 1, 8>}, {transform_indices = @transform_6, window_bounds = array<i64: 8, 8>}]} {
    %c0 = arith.constant 0 : index
    %c0_0 = arith.constant 0 : index
    %0 = vector.load %arg1[%c0, %c0_0] : memref<8x16xf32, #tpu.memory_space<vmem>>, vector<8x16xf32>
    %c0_1 = arith.constant 0 : index
    %c0_2 = arith.constant 0 : index
    %1 = vector.load %arg2[%c0_1, %c0_2] : memref<16x64xf32, #tpu.memory_space<vmem>>, vector<16x64xf32>
    %cst = arith.constant dense<0.000000e+00> : vector<8x64xf32>
    %2 = tpu.matmul %0, %1, %cst {dimension_numbers = #tpu.dot_dimension_numbers<[1], [0], [0], [1], [0, 0, 1, 1], [], []>} : vector<8x16xf32>, vector<16x64xf32>, vector<8x64xf32> -> vector<8x64xf32>
    %cst_3 = arith.constant 0.000000e+00 : f32
    %3 = vector.broadcast %cst_3 : f32 to vector<8x64xf32>
    %4 = arith.maximumf %2, %3 : vector<8x64xf32>
    %c0_4 = arith.constant 0 : index
    %c0_5 = arith.constant 0 : index
    %5 = vector.load %arg3[%c0_4, %c0_5] : memref<64x64xf32, #tpu.memory_space<vmem>>, vector<64x64xf32>
    %cst_6 = arith.constant dense<0.000000e+00> : vector<8x64xf32>
    %6 = tpu.matmul %4, %5, %cst_6 {dimension_numbers = #tpu.dot_dimension_numbers<[1], [0], [0], [1], [0, 0, 1, 1], [], []>} : vector<8x64xf32>, vector<64x64xf32>, vector<8x64xf32> -> vector<8x64xf32>
    %c0_7 = arith.constant 0 : index
    %c0_8 = arith.constant 0 : index
    %7 = vector.load %arg4[%c0_7, %c0_8] : memref<1x64xf32, #tpu.memory_space<vmem>>, vector<1x64xf32>
    %8 = vector.broadcast %7 : vector<1x64xf32> to vector<8x64xf32>
    %9 = arith.addf %6, %8 : vector<8x64xf32>
    %cst_9 = arith.constant 0.000000e+00 : f32
    %10 = vector.broadcast %cst_9 : f32 to vector<8x64xf32>
    %11 = arith.maximumf %9, %10 : vector<8x64xf32>
    %c0_10 = arith.constant 0 : index
    %c0_11 = arith.constant 0 : index
    %12 = vector.load %arg5[%c0_10, %c0_11] : memref<64x8xf32, #tpu.memory_space<vmem>>, vector<64x8xf32>
    %cst_12 = arith.constant dense<0.000000e+00> : vector<8x8xf32>
    %13 = tpu.matmul %11, %12, %cst_12 {dimension_numbers = #tpu.dot_dimension_numbers<[1], [0], [0], [1], [0, 0, 1, 1], [], []>} : vector<8x64xf32>, vector<64x8xf32>, vector<8x8xf32> -> vector<8x8xf32>
    %c0_13 = arith.constant 0 : index
    %c0_14 = arith.constant 0 : index
    %14 = vector.load %arg6[%c0_13, %c0_14] : memref<1x8xf32, #tpu.memory_space<vmem>>, vector<1x8xf32>
    %15 = vector.broadcast %14 : vector<1x8xf32> to vector<8x8xf32>
    %16 = arith.addf %13, %15 : vector<8x8xf32>
    %cst_15 = arith.constant 0.000000e+00 : f32
    %17 = vector.broadcast %cst_15 : f32 to vector<8x8xf32>
    %18 = arith.cmpf olt, %16, %17 : vector<8x8xf32>
    %cst_16 = arith.constant 0.000000e+00 : f32
    %19 = vector.broadcast %cst_16 : f32 to vector<8x8xf32>
    %20 = arith.subf %19, %16 : vector<8x8xf32>
    %21 = arith.select %18, %16, %20 : vector<8x8xi1>, vector<8x8xf32>
    %22 = math.exp %21 : vector<8x8xf32>
    %cst_17 = arith.constant 1.000000e+00 : f32
    %23 = vector.broadcast %cst_17 : f32 to vector<8x8xf32>
    %24 = arith.select %18, %22, %23 : vector<8x8xi1>, vector<8x8xf32>
    %cst_18 = arith.constant 1.000000e+00 : f32
    %25 = vector.broadcast %cst_18 : f32 to vector<8x8xf32>
    %26 = arith.addf %25, %22 : vector<8x8xf32>
    %27 = arith.divf %24, %26 : vector<8x8xf32>
    %c0_19 = arith.constant 0 : index
    %c0_20 = arith.constant 0 : index
    %28 = vector.load %arg7[%c0_19, %c0_20] : memref<8x8xf32, #tpu.memory_space<vmem>>, vector<8x8xf32>
    tpu.vector_store %arg7[%c0_19, %c0_20], %27 {strides = array<i32>} : memref<8x8xf32, #tpu.memory_space<vmem>>, vector<8x8xf32>,
    return
  }
  func.func @transform_0(%arg0: i32) -> (i32, i32) {
    %c0_i32 = arith.constant 0 : i32
    %c0_i32_0 = arith.constant 0 : i32
    return %arg0, %c0_i32 : i32, i32
  }
  func.func @transform_1(%arg0: i32) -> (i32, i32) {
    %c0_i32 = arith.constant 0 : i32
    %c0_i32_0 = arith.constant 0 : i32
    %c0_i32_1 = arith.constant 0 : i32
    return %c0_i32, %c0_i32_0 : i32, i32
  }
  func.func @transform_2(%arg0: i32) -> (i32, i32) {
    %c0_i32 = arith.constant 0 : i32
    %c0_i32_0 = arith.constant 0 : i32
    %c0_i32_1 = arith.constant 0 : i32
    return %c0_i32, %c0_i32_0 : i32, i32
  }
  func.func @transform_3(%arg0: i32) -> (i32, i32) {
    %c0_i32 = arith.constant 0 : i32
    %c0_i32_0 = arith.constant 0 : i32
    %c0_i32_1 = arith.constant 0 : i32
    return %c0_i32, %c0_i32_0 : i32, i32
  }
  func.func @transform_4(%arg0: i32) -> (i32, i32) {
    %c0_i32 = arith.constant 0 : i32
    %c0_i32_0 = arith.constant 0 : i32
    %c0_i32_1 = arith.constant 0 : i32
    return %c0_i32, %c0_i32_0 : i32, i32
  }
  func.func @transform_5(%arg0: i32) -> (i32, i32) {
    %c0_i32 = arith.constant 0 : i32
    %c0_i32_0 = arith.constant 0 : i32
    %c0_i32_1 = arith.constant 0 : i32
    return %c0_i32, %c0_i32_0 : i32, i32
  }
  func.func @transform_6(%arg0: i32) -> (i32, i32) {
    %c0_i32 = arith.constant 0 : i32
    %c0_i32_0 = arith.constant 0 : i32
    return %arg0, %c0_i32 : i32, i32
  }
}

</mosaic_0001>

<bundles_post_ra>
// kernel: tpu_custom_call.1
= control target key start
LH: loop header
LB: loop body
LE: loop exit
PB: predicated region body
PF: predicated region fallthrough
CT: control target
= control target key end

     0   :  { %11 = vsyncpa [#allocation3], 0  ;;  %s603_s0 = inlined_call_operand.vmem [shape: f32[8,16], index: 0, kind: input, shape index: {}]   ;;  %s604_s1 = inlined_call_operand.hbm [shape: f32[16,64], index: 1, kind: input, shape index: {}]   ;;  %s605_s2 = inlined_call_operand.vmem [shape: f32[64,64], index: 2, kind: input, shape index: {}]   ;;  %s606_s3 = inlined_call_operand.vmem [shape: f32[1,64], index: 3, kind: input, shape index: {}]   ;;  %s607_s4 = inlined_call_operand.vmem [shape: f32[64,8], index: 4, kind: input, shape index: {}]   ;;  %s608_s5 = inlined_call_operand.vmem [shape: f32[1,8], index: 5, kind: input, shape index: {}]   ;;  %s609_s6 = inlined_call_operand.hbm [shape: f32[8,8], index: 6, kind: output, shape index: {}]  }
   0x1   :  { %12 = vsyncpa [#allocation4], 0  ;;  %s477_s21 = smov [#allocation2]   ;;  %s429_s25 = scalar_lea.hbm %s604_s1, 256 }
   0x2   :  { %s20_s22 = sshll.u32 %s477_s21, 4  ;;  %p430_p0 = scmp.ne.s32.totalorder %s604_s1, %s429_s25  ;;  %s21_s22 = int_to_ptr.vmem [resolvable:$true] %s20_s22 }
   0x3   :  { %p433_p1 = scmp.lt.u32.totalorder %s429_s25, %s604_s1 }
   0x5   :  { %p435_p2 = pnand %p433_p1, %p430_p0 }
   0x7   :  { %438 = shalt.err (!%p435_p2)
}
   0x8   :  { %s439_s30 = scalar_lea.vmem %s21_s22, 256  ;;  %p444_p4 = scmp.lt.s32.totalorder %s21_s22, %s21_s22 }
   0x9   :  { %p440_p3 = scmp.ne.s32.totalorder %s21_s22, %s439_s30  ;;  %p445_p5 = scmp.lt.s32.totalorder %s439_s30, %s439_s30 }
   0xb   :  { %p446_p6 = por %p445_p5, %p444_p4 }
   0xd   :  { %p447_p7 = pnand %p446_p6, %p440_p3 }
   0xf   :  { %450 = shalt.err (!%p447_p7)
}
  0x10   :  { %s478_s7 = smov 128   ;;  %s479_s8 = smov 8  }
  0x11   :  { %26 = dma.hbm_to_vmem [thread:$0]  %s604_s1, 256, %s21_s22, [#allocation3], %s478_s7, %s478_s7, %s479_s8  }
  0x12   :  { %473 = dma.done.wait [#allocation3], 256  }
  0x13   :  { %474 = vsyncadd [#allocation3], 4294967040  ;;  %v480_v0 = vmov 0.0|0.0   ;;  %vm481_vm0 = vmmov 0   ;;  %v482_v1 = vmov 0.0   ;;  %v39_v2 = vld [vmem:[#allocation2] sm:$0xff] }
  0x14   :  { %391 = vmatprep.subr.bf16.mxu0 %v480_v0  ;;  %350 = vmatprep.mubr.msk.f32.mxu0 %vm481_vm0, %v482_v1  ;;  %v40_v3 = vld [vmem:[#allocation2 + $0x8] sm:$0xff]  ;;  %v116_v5 = vld [vmem:[%s605_s2] sm:$0xff]  ;;  %v118_v7 = vld [vmem:[%s605_s2 + $0x10] sm:$0xff]  ;;  %vm41_vm1 = vcmask 130048   ;;  %vm131_vm2 = vcmask 523264   ;;  %vm303_vm4 = vcmask 64512  }
  0x15   :  { %394 = vmatprep.subr.bf16.mxu1 %v480_v0  ;;  %369 = vmatprep.mubr.msk.f32.mxu1 %vm481_vm0, %v482_v1  ;;  %v392_v4 = vpack.c.bf16 %v40_v3, %v39_v2  ;;  %v117_v6 = vld [vmem:[%s605_s2 + $0x8] sm:$0xff]  ;;  %v119_v9 = vld [vmem:[%s605_s2 + $0x18] sm:$0xff]  ;;  %v38_v10 = vld [vmem:[%s603_s0] sm:$0xff] }
  0x16   :  { %v395_v8 = vpack.c.bf16 %v117_v6, %v116_v5  ;;  %v398_v11 = vpack.c.bf16 %v119_v9, %v118_v7  ;;  %v120_v12 = vld [vmem:[%s605_s2 + $0x20] sm:$0xff]  ;;  %v121_v13 = vld [vmem:[%s605_s2 + $0x28] sm:$0xff]  ;;  %v122_v15 = vld [vmem:[%s605_s2 + $0x30] sm:$0xff] }
  0x17   :  { %393 = vmatpush3.bf16.msra.mxu0 %v392_v4  ;;  %v401_v14 = vpack.c.bf16 %v121_v13, %v120_v12  ;;  %v123_v16 = vld [vmem:[%s605_s2 + $0x38] sm:$0xff]  ;;  %v206_v18 = vld [vmem:[%s607_s4] sm:$0xff]  ;;  %v207_v19 = vld [vmem:[%s607_s4 + $0x8] sm:$0xff] }
  0x18   :  { %396 = vmatpush3.bf16.msra.mxu1 %v395_v8  ;;  %406 = vmatprep.subr.bf16.mxu0 %v480_v0  ;;  %v404_v17 = vpack.c.bf16 %v123_v16, %v122_v15  ;;  %v208_v20 = vld [vmem:[%s607_s4 + $0x10] sm:$0xff]  ;;  %v407_v21 = vpack.c.bf16 %v207_v19, %v206_v18  ;;  %v209_v22 = vld [vmem:[%s607_s4 + $0x18] sm:$0xff]  ;;  %v210_v24 = vld [vmem:[%s607_s4 + $0x20] sm:$0xff] }
  0x19   :  { %397 = vmatprep.subr.bf16.mxu1 %v480_v0  ;;  %v410_v23 = vpack.c.bf16 %v209_v22, %v208_v20  ;;  %v211_v25 = vld [vmem:[%s607_s4 + $0x28] sm:$0xff]  ;;  %v212_v30 = vld [vmem:[%s607_s4 + $0x30] sm:$0xff]  ;;  %v213_v31 = vld [vmem:[%s607_s4 + $0x38] sm:$0xff] }
  0x1a   :  { %351 = vmatmul.mubr.msk.f32.vlgmr.msra.gmra.mrb[0].mxu0 %vm41_vm1, %v38_v10  ;;  %v413_v26 = vpack.c.bf16 %v211_v25, %v210_v24  ;;  %v416_v32 = vpack.c.bf16 %v213_v31, %v212_v30  ;;  %v321_v33 = vld [vmem:[%s606_s3] ss:$0 sm:$0xff]  ;;  %s483_s3 = smov [#allocation5]  }
  0x1b   :  { %388 = vmatprep.mubr.msk.f32.mxu0 %vm481_vm0, %v482_v1  ;;  %408 = vmatpush3.bf16.msra.mxu0 %v407_v21  ;;  %v323_v38 = vld [vmem:[%s608_s5] ss:$0 sm:$0xff]  ;;  %s311_s4 = sshll.u32 %s483_s3, 4  ;;  %s312_s4 = int_to_ptr.vmem [resolvable:$true] %s311_s4 }
  0x1c   :  { %399 = vmatpush3.bf16.msra.mxu1 %v398_v11  ;;  %409 = vmatprep.subr.bf16.mxu0 %v480_v0  ;;  %s451_s5 = scalar_lea.vmem %s312_s4, 128  ;;  %p456_p9 = scmp.lt.s32.totalorder %s312_s4, %s312_s4 }
  0x1d   :  { %400 = vmatprep.subr.bf16.mxu1 %v480_v0  ;;  %p452_p8 = scmp.ne.s32.totalorder %s312_s4, %s451_s5  ;;  %p457_p10 = scmp.lt.s32.totalorder %s451_s5, %s451_s5 }
  0x1f   :  { %411 = vmatpush3.bf16.msra.mxu0 %v410_v23  ;;  %p458_p11 = por %p457_p10, %p456_p9 }
  0x20   :  { %402 = vmatpush3.bf16.msra.mxu1 %v401_v14  ;;  %412 = vmatprep.subr.bf16.mxu0 %v480_v0 }
  0x21   :  { %403 = vmatprep.subr.bf16.mxu1 %v480_v0  ;;  %p459_p12 = pnand %p458_p11, %p452_p8 }
  0x23   :  { %414 = vmatpush3.bf16.msra.mxu0 %v413_v26 }
  0x24   :  { %405 = vmatpush3.bf16.msra.mxu1 %v404_v17  ;;  %415 = vmatprep.subr.bf16.mxu0 %v480_v0 }
  0x27   :  { %417 = vmatpush3.bf16.msra.mxu0 %v416_v32 }
  0xed   :  { %v111_v27 = vpop.f32.mrb[0].mxu0 }
  0xee   :  { %v115_v28 = vmax.f32 %v111_v27, 0.0  ;;  %v352_v29 = vpop.f32.mrb[1].mxu0 }
  0xf0   :  { %370 = vmatmul.mubr.msk.f32.vlgmr.msra.gmra.mrb[0].mxu1 %vm131_vm2, %v115_v28 }
 0x1c3   :  { %v201_v34 = vpop.f32.mrb[0].mxu1 }
 0x1c4   :  { %v202_v35 = vadd.f32 %v321_v33, %v201_v34  ;;  %v371_v36 = vpop.f32.mrb[1].mxu1 }
 0x1c6   :  { %v205_v37 = vmax.f32 %v202_v35, 0.0 }
 0x1c8   :  { %389 = vmatmul.mubr.msk.f32.vlgmr.msra.gmra.mrb[2].mxu0 %vm131_vm2, %v205_v37 }
 0x29b   :  { %v290_v39 = vpop.f32.mrb[2].mxu0 }
 0x29c   :  { %v291_v40 = vadd.f32 %v323_v38, %v290_v39  ;;  %v390_v41 = vpop.f32.mrb[3].mxu0 }
 0x29e   :  { %vm294_vm3 = vcmp.lt.f32.partialorder %v291_v40, 0.0  ;;  %v295_v42 = vsub.f32 0.0, %v291_v40 }
 0x2a0   :  { %v296_v43 = vsel %vm294_vm3, %v291_v40, %v295_v42 }
 0x2a1   :  { %v297_v44 = vmul.f32 1.442695, %v296_v43 }
 0x2a3   :  { %425 = vpow2.f32 %v297_v44 }
 0x2ad   :  { %v426_v45 = vpop.eup %425 }
 0x2ae   :  { %v300_v46 = vadd.f32 1.0, %v426_v45  ;;  %v299_v48 = vsel %vm294_vm3, %v426_v45, 1.0 }
 0x2b0   :  { %427 = vrcp.f32 %v300_v46 }
 0x2ba   :  { %v428_v47 = vpop.eup %427 }
 0x2bb   :  { %v302_v49 = vmul.f32 %v428_v47, %v299_v48 }
 0x2bd   :  { %304 = vst.msk [vmem:[#allocation5] sm:$0xff] %vm303_vm4, %v302_v49 }
 0x2be   :  { %462 = shalt.err (!%p459_p12)
}
 0x2bf   :  { %s463_s23 = scalar_lea.hbm %s609_s6, 128 }
 0x2c0   :  { %p464_p13 = scmp.ne.s32.totalorder %s609_s6, %s463_s23  ;;  %p467_p0 = scmp.lt.u32.totalorder %s463_s23, %s609_s6 }
 0x2c2   :  { %p469_p1 = pnand %p467_p0, %p464_p13 }
 0x2c4   :  { %472 = shalt.err (!%p469_p1)
}
 0x2c5   :  { %314 = dma.vmem_to_hbm [thread:$0]  %s312_s4, 128, %s609_s6, [#allocation4]  }
 0x2c6   :  { %475 = dma.done.wait [#allocation4], 128  }
 0x2c7   :  { %476 = vsyncadd [#allocation4], 4294967168 }
 0x2c8   :  { %318 = vsyncpa [#allocation3], 1 }
 0x2c9   :  { %319 = vsyncpa [#allocation4], 1 }

</bundles_post_ra>
